<compile_context>
chip_gen: v7x
topology: tpu7x:2x2x1
jax: 0.10.0
libtpu: 0.0.40
codegen_flags: <defaults>
</compile_context>

<pallas_src>
import functools

import jax
import jax.numpy as jnp
from jax.experimental import pallas as pl
from jax.experimental.pallas import tpu as pltpu

INPUT_SIZE = 88      # as in the PyTorch module
HIDDEN = 128
NUM_CLASSES = 24     # stand-in for len(label_encoder.classes_) (data-dependent)

_SUBLANE = 8
_DEFAULT_BLOCK_ROWS = 2048   # ~8 MiB VMEM w/ double buffers; fits v5e/v6e/v7x defaults


def _round_up(x: int, m: int) -> int:
    return ((x + m - 1) // m) * m


def _mlp_kernel(x_ref, w1_ref, b1_ref, w2_ref, b2_ref, o_ref):
    # fc1: cast activations to bf16 in-kernel (no host pad/cast pass),
    # f32 accumulation on the MXU.
    x = x_ref[...].astype(jnp.bfloat16)
    h = jnp.dot(x, w1_ref[...], preferred_element_type=jnp.float32)
    # bias + ReLU in f32.
    h = jnp.maximum(h + b1_ref[...], 0.0)
    # fc2: bf16 operands, f32 accumulation; output stays num_classes-wide.
    out = jnp.dot(h.astype(jnp.bfloat16), w2_ref[...],
                  preferred_element_type=jnp.float32)
    o_ref[...] = (out + b2_ref[...]).astype(o_ref.dtype)


@functools.partial(jax.jit, static_argnames=("block_rows",))
def chord_classifier_forward(x, w1, b1, w2, b2, *, block_rows=_DEFAULT_BLOCK_ROWS):
    """x: (B, 88) f32; w1: (88, H); b1: (H,); w2: (H, C); b2: (C,).
    Weights are stored (in_features, out_features), i.e. PyTorch W.T.
    Returns logits (B, C) f32.
    """
    B, F = x.shape
    H = w1.shape[1]
    C = w2.shape[1]

    # Tiny one-time param casts/reshapes (a few KB; negligible).
    w1b = w1.astype(jnp.bfloat16)
    w2b = w2.astype(jnp.bfloat16)
    b1r = b1.reshape(1, H).astype(jnp.float32)
    b2r = b2.reshape(1, C).astype(jnp.float32)

    # Batch tiling: single full-extent block when B fits in one tile
    # (full-dim block sizes are always legal, no padding needed); otherwise
    # balanced 8-row-aligned tiles so B just above block_rows doesn't
    # ~double the work.  Partial last block (if any) is masked by Pallas.
    if B <= block_rows:
        tb = B
    else:
        nb = pl.cdiv(B, block_rows)
        tb = _round_up(pl.cdiv(B, nb), _SUBLANE)
    grid = (pl.cdiv(B, tb),)

    cost = pl.CostEstimate(
        flops=2 * B * (F * H + H * C),
        transcendentals=0,
        bytes_accessed=B * F * 4 + B * C * 4 + F * H * 2 + H * C * 2 + (H + C) * 4,
    )

    return pl.pallas_call(
        _mlp_kernel,
        out_shape=jax.ShapeDtypeStruct((B, C), jnp.float32),
        grid=grid,
        in_specs=[
            # x tile marches over the batch; double-buffered by the pipeline.
            pl.BlockSpec((tb, F), lambda i: (i, 0)),
            # weights / biases: same block every step -> fetched once, resident.
            pl.BlockSpec((F, H), lambda i: (0, 0)),
            pl.BlockSpec((1, H), lambda i: (0, 0)),
            pl.BlockSpec((H, C), lambda i: (0, 0)),
            pl.BlockSpec((1, C), lambda i: (0, 0)),
        ],
        out_specs=pl.BlockSpec((tb, C), lambda i: (i, 0)),
        compiler_params=pltpu.CompilerParams(
            dimension_semantics=("parallel",)),
        cost_estimate=cost,
    )(x, w1b, b1r, w2b, b2r)


def init_params(key):
    """Deterministic init mimicking nn.Linear's U(-1/sqrt(fan_in), +1/sqrt(fan_in))."""
    k1, k2, k3, k4 = jax.random.split(key, 4)
    bound1 = 1.0 / jnp.sqrt(INPUT_SIZE)
    bound2 = 1.0 / jnp.sqrt(HIDDEN)
    w1 = jax.random.uniform(k1, (INPUT_SIZE, HIDDEN), jnp.float32, -bound1, bound1)
    b1 = jax.random.uniform(k2, (HIDDEN,), jnp.float32, -bound1, bound1)
    w2 = jax.random.uniform(k3, (HIDDEN, NUM_CLASSES), jnp.float32, -bound2, bound2)
    b2 = jax.random.uniform(k4, (NUM_CLASSES,), jnp.float32, -bound2, bound2)
    return w1, b1, w2, b2


def _reference(x, w1, b1, w2, b2):
    # Same bf16-operand / f32-accumulate arithmetic as the kernel.
    h = jnp.dot(x.astype(jnp.bfloat16), w1.astype(jnp.bfloat16),
                preferred_element_type=jnp.float32)
    h = jnp.maximum(h + b1.reshape(1, -1), 0.0)
    out = jnp.dot(h.astype(jnp.bfloat16), w2.astype(jnp.bfloat16),
                  preferred_element_type=jnp.float32)
    return out + b2.reshape(1, -1)


def _check(logits, x, w1, b1, w2, b2):
    ref = _reference(x, w1, b1, w2, b2)
    assert logits.shape == ref.shape
    assert jnp.allclose(logits, ref, atol=1e-2, rtol=1e-2), \
        float(jnp.max(jnp.abs(logits - ref)))
    # Sanity vs. full-f32 math (bf16 operand error bound).
    ref_f32 = jnp.maximum(x @ w1 + b1, 0.0) @ w2 + b2
    assert jnp.allclose(logits, ref_f32, atol=5e-2, rtol=5e-2)


if __name__ == "__main__":
    key = jax.random.PRNGKey(0)
    kx, kx2, kx3, kx4, kp = jax.random.split(key, 5)
    w1, b1, w2, b2 = init_params(kp)

    # Small aligned batch -> single full-extent block.
    x = jax.random.normal(kx, (8, INPUT_SIZE), jnp.float32)
    logits = jax.block_until_ready(chord_classifier_forward(x, w1, b1, w2, b2))
    _check(logits, x, w1, b1, w2, b2)

    # Ragged batch (non-multiple-of-8 rows, still a single block).
    x2 = jax.random.normal(kx2, (37, INPUT_SIZE), jnp.float32)
    logits2 = jax.block_until_ready(chord_classifier_forward(x2, w1, b1, w2, b2))
    _check(logits2, x2, w1, b1, w2, b2)

    # Tiny batch (fewer rows than one sublane group).
    x3 = jax.random.normal(kx3, (2, INPUT_SIZE), jnp.float32)
    logits3 = jax.block_until_ready(chord_classifier_forward(x3, w1, b1, w2, b2))
    _check(logits3, x3, w1, b1, w2, b2)

    # Multi-tile path with a partial last block (small block_rows override so
    # the test stays tiny): grid=3 tiles of 16 rows over 40 rows.
    x4 = jax.random.normal(kx4, (40, INPUT_SIZE), jnp.float32)
    logits4 = jax.block_until_ready(
        chord_classifier_forward(x4, w1, b1, w2, b2, block_rows=16))
    _check(logits4, x4, w1, b1, w2, b2)

    print("KERNEL_OK")
</pallas_src>

<mosaic_0001>
module attributes {stable_mosaic.version = 11 : i64} {
  func.func @_mlp_kernel(%arg0: i32, %arg1: memref<8x88xf32, #tpu.memory_space<vmem>>, %arg2: memref<88x128xbf16, #tpu.memory_space<vmem>>, %arg3: memref<1x128xf32, #tpu.memory_space<vmem>>, %arg4: memref<128x24xbf16, #tpu.memory_space<vmem>>, %arg5: memref<1x24xf32, #tpu.memory_space<vmem>>, %arg6: memref<8x24xf32, #tpu.memory_space<vmem>>) attributes {dimension_semantics = [#tpu.dimension_semantics<parallel>], iteration_bounds = array<i64: 1>, scalar_prefetch = 0 : i64, scratch_operands = 0 : i64, tpu.core_type = #tpu.core_type<tc>, window_params = [{transform_indices = @transform_0, window_bounds = array<i64: 8, 88>}, {pipeline_mode = #tpu.pipeline_mode<synchronous>, transform_indices = @transform_1, window_bounds = array<i64: 88, 128>}, {pipeline_mode = #tpu.pipeline_mode<synchronous>, transform_indices = @transform_2, window_bounds = array<i64: 1, 128>}, {pipeline_mode = #tpu.pipeline_mode<synchronous>, transform_indices = @transform_3, window_bounds = array<i64: 128, 24>}, {pipeline_mode = #tpu.pipeline_mode<synchronous>, transform_indices = @transform_4, window_bounds = array<i64: 1, 24>}, {transform_indices = @transform_5, window_bounds = array<i64: 8, 24>}]} {
    %c0 = arith.constant 0 : index
    %c0_0 = arith.constant 0 : index
    %0 = vector.load %arg1[%c0, %c0_0] : memref<8x88xf32, #tpu.memory_space<vmem>>, vector<8x88xf32>
    %1 = arith.truncf %0 : vector<8x88xf32> to vector<8x88xbf16>
    %c0_1 = arith.constant 0 : index
    %c0_2 = arith.constant 0 : index
    %2 = vector.load %arg2[%c0_1, %c0_2] : memref<88x128xbf16, #tpu.memory_space<vmem>>, vector<88x128xbf16>
    %cst = arith.constant dense<0.000000e+00> : vector<8x128xf32>
    %3 = tpu.matmul %1, %2, %cst {dimension_numbers = #tpu.dot_dimension_numbers<[1], [0], [0], [1], [0, 0, 1, 1], [], []>} : vector<8x88xbf16>, vector<88x128xbf16>, vector<8x128xf32> -> vector<8x128xf32>
    %c0_3 = arith.constant 0 : index
    %c0_4 = arith.constant 0 : index
    %4 = vector.load %arg3[%c0_3, %c0_4] : memref<1x128xf32, #tpu.memory_space<vmem>>, vector<1x128xf32>
    %5 = vector.broadcast %4 : vector<1x128xf32> to vector<8x128xf32>
    %6 = arith.addf %3, %5 : vector<8x128xf32>
    %cst_5 = arith.constant 0.000000e+00 : f32
    %7 = vector.broadcast %cst_5 : f32 to vector<8x128xf32>
    %8 = arith.maximumf %6, %7 : vector<8x128xf32>
    %9 = arith.truncf %8 : vector<8x128xf32> to vector<8x128xbf16>
    %c0_6 = arith.constant 0 : index
    %c0_7 = arith.constant 0 : index
    %10 = vector.load %arg4[%c0_6, %c0_7] : memref<128x24xbf16, #tpu.memory_space<vmem>>, vector<128x24xbf16>
    %cst_8 = arith.constant dense<0.000000e+00> : vector<8x24xf32>
    %11 = tpu.matmul %9, %10, %cst_8 {dimension_numbers = #tpu.dot_dimension_numbers<[1], [0], [0], [1], [0, 0, 1, 1], [], []>} : vector<8x128xbf16>, vector<128x24xbf16>, vector<8x24xf32> -> vector<8x24xf32>
    %c0_9 = arith.constant 0 : index
    %c0_10 = arith.constant 0 : index
    %12 = vector.load %arg5[%c0_9, %c0_10] : memref<1x24xf32, #tpu.memory_space<vmem>>, vector<1x24xf32>
    %13 = vector.broadcast %12 : vector<1x24xf32> to vector<8x24xf32>
    %14 = arith.addf %11, %13 : vector<8x24xf32>
    %c0_11 = arith.constant 0 : index
    %c0_12 = arith.constant 0 : index
    %15 = vector.load %arg6[%c0_11, %c0_12] : memref<8x24xf32, #tpu.memory_space<vmem>>, vector<8x24xf32>
    tpu.vector_store %arg6[%c0_11, %c0_12], %14 {strides = array<i32>} : memref<8x24xf32, #tpu.memory_space<vmem>>, vector<8x24xf32>,
    return
  }
  func.func @transform_0(%arg0: i32) -> (i32, i32) {
    %c0_i32 = arith.constant 0 : i32
    %c0_i32_0 = arith.constant 0 : i32
    return %arg0, %c0_i32 : i32, i32
  }
  func.func @transform_1(%arg0: i32) -> (i32, i32) {
    %c0_i32 = arith.constant 0 : i32
    %c0_i32_0 = arith.constant 0 : i32
    %c0_i32_1 = arith.constant 0 : i32
    return %c0_i32, %c0_i32_0 : i32, i32
  }
  func.func @transform_2(%arg0: i32) -> (i32, i32) {
    %c0_i32 = arith.constant 0 : i32
    %c0_i32_0 = arith.constant 0 : i32
    %c0_i32_1 = arith.constant 0 : i32
    return %c0_i32, %c0_i32_0 : i32, i32
  }
  func.func @transform_3(%arg0: i32) -> (i32, i32) {
    %c0_i32 = arith.constant 0 : i32
    %c0_i32_0 = arith.constant 0 : i32
    %c0_i32_1 = arith.constant 0 : i32
    return %c0_i32, %c0_i32_0 : i32, i32
  }
  func.func @transform_4(%arg0: i32) -> (i32, i32) {
    %c0_i32 = arith.constant 0 : i32
    %c0_i32_0 = arith.constant 0 : i32
    %c0_i32_1 = arith.constant 0 : i32
    return %c0_i32, %c0_i32_0 : i32, i32
  }
  func.func @transform_5(%arg0: i32) -> (i32, i32) {
    %c0_i32 = arith.constant 0 : i32
    %c0_i32_0 = arith.constant 0 : i32
    return %arg0, %c0_i32 : i32, i32
  }
}

</mosaic_0001>

<bundles_post_ra>
// kernel: chord_classifier_forward.1
= control target key start
LH: loop header
LB: loop body
LE: loop exit
PB: predicated region body
PF: predicated region fallthrough
CT: control target
= control target key end

     0   :  { %v362_v1 = vmov 0.0   ;;  %vm363_vm0 = vmmov 0   ;;  %s458_s0 = inlined_call_operand.vmem [shape: f32[8,88], index: 0, kind: input, shape index: {}]   ;;  %s459_s1 = inlined_call_operand.vmem [shape: bf16[88,128], index: 1, kind: input, shape index: {}]   ;;  %s460_s2 = inlined_call_operand.vmem [shape: f32[1,128], index: 2, kind: input, shape index: {}]   ;;  %s461_s3 = inlined_call_operand.vmem [shape: bf16[128,24], index: 3, kind: input, shape index: {}]   ;;  %s462_s4 = inlined_call_operand.vmem [shape: f32[1,24], index: 4, kind: input, shape index: {}]   ;;  %s463_s5 = inlined_call_operand.hbm [shape: f32[8,24], index: 5, kind: output, shape index: {}]  }
   0x1   :  { %v324_v0 = vld [vmem:[%s459_s1] sm:$0xff]   ;;  %285 = vmatprep.subr.bf16.mxu0 %v362_v1  ;;  %301 = vmatprep.subr.bf16.mxu1 %v362_v1  ;;  %v325_v2 = vld [vmem:[%s459_s1 + $0x8] sm:$0xff]   ;;  %v326_v3 = vld [vmem:[%s459_s1 + $0x10] sm:$0xff]  }
   0x2   :  { %286 = vmatpush3.bf16.msra.mxu0 %v324_v0  ;;  %297 = vmatprep.mubr.msk.bf16.mxu0 %vm363_vm0, %v362_v1  ;;  %v330_v4 = vld [vmem:[%s461_s3] sm:$0xff]   ;;  %v331_v5 = vld [vmem:[%s461_s3 + $0x8] sm:$0xff]   ;;  %v327_v6 = vld [vmem:[%s459_s1 + $0x18] sm:$0xff]  }
   0x3   :  { %287 = vmatprep.subr.bf16.mxu0 %v362_v1  ;;  %317 = vmatprep.mubr.msk.bf16.mxu1 %vm363_vm0, %v362_v1  ;;  %v332_v7 = vld [vmem:[%s461_s3 + $0x10] sm:$0xff]  }
   0x4   :  { %302 = vmatpush3.bf16.msra.mxu1 %v330_v4 }
   0x5   :  { %303 = vmatprep.subr.bf16.mxu1 %v362_v1 }
   0x6   :  { %288 = vmatpush3.bf16.msra.mxu0 %v325_v2 }
   0x7   :  { %289 = vmatprep.subr.bf16.mxu0 %v362_v1 }
   0x8   :  { %304 = vmatpush3.bf16.msra.mxu1 %v331_v5 }
   0x9   :  { %305 = vmatprep.subr.bf16.mxu1 %v362_v1 }
   0xa   :  { %290 = vmatpush3.bf16.msra.mxu0 %v326_v3 }
   0xb   :  { %291 = vmatprep.subr.bf16.mxu0 %v362_v1 }
   0xc   :  { %10 = vsyncpa [#allocation3], 0  ;;  %v328_v8 = vld [vmem:[%s459_s1 + $0x20] sm:$0xff]   ;;  %v329_v9 = vld [vmem:[%s459_s1 + $0x28] ss:$0 sps:$4 sm:$0xff]   ;;  %vm79_vm1 = vcmask 1043456   ;;  %306 = vmatpush3.bf16.msra.mxu1 %v332_v7 }
   0xd   :  { %v333_v10 = vld [vmem:[%s461_s3 + $0x18] sm:$0xff]   ;;  %307 = vmatprep.subr.bf16.mxu1 %v362_v1  ;;  %v22_v11 = vld [vmem:[%s458_s0] sm:$0xff]  ;;  %v81_v12 = vsel %vm79_vm1, %v329_v9, 0  ;;  %vm75_vm2 = vcmask 719872   ;;  %v335_v15 = vld [vmem:[%s461_s3 + $0x28] sm:$0xff]   ;;  %s364_s25 = smov [#allocation2]  }
   0xe   :  { %292 = vmatpush3.bf16.msra.mxu0 %v327_v6  ;;  %v334_v13 = vld [vmem:[%s461_s3 + $0x20] sm:$0xff]   ;;  %v23_v14 = vpack.c.bf16 %v22_v11, %v22_v11  ;;  %v336_v16 = vld [vmem:[%s461_s3 + $0x30] sm:$0xff]   ;;  %v337_v17 = vld [vmem:[%s461_s3 + $0x38] sm:$0xff]   ;;  %s244_s26 = sshll.u32 %s364_s25, 4  ;;  %vm236_vm3 = vcmask 195584   ;;  %s245_s26 = int_to_ptr.vmem [resolvable:$true] %s244_s26 }
   0xf   :  { %293 = vmatprep.subr.bf16.mxu0 %v362_v1  ;;  %v252_v18 = vld [vmem:[%s460_s2] ss:$0 sm:$0xff]  ;;  %s338_s2 = scalar_lea.vmem %s245_s26, 128  ;;  %p343_p1 = scmp.lt.s32.totalorder %s245_s26, %s245_s26 }
  0x10   :  { %308 = vmatpush3.bf16.msra.mxu1 %v333_v10  ;;  %v260_v26 = vld [vmem:[%s462_s4] ss:$0 sm:$0xff]  ;;  %p339_p0 = scmp.ne.s32.totalorder %s245_s26, %s338_s2  ;;  %p344_p2 = scmp.lt.s32.totalorder %s338_s2, %s338_s2 }
  0x11   :  { %309 = vmatprep.subr.bf16.mxu1 %v362_v1 }
  0x12   :  { %294 = vmatpush3.bf16.msra.mxu0 %v328_v8  ;;  %p345_p3 = por %p344_p2, %p343_p1 }
  0x13   :  { %295 = vmatprep.subr.bf16.mxu0 %v362_v1 }
  0x14   :  { %310 = vmatpush3.bf16.msra.mxu1 %v334_v13  ;;  %p346_p4 = pnand %p345_p3, %p339_p0 }
  0x15   :  { %311 = vmatprep.subr.bf16.mxu1 %v362_v1 }
  0x16   :  { %296 = vmatpush3.bf16.msra.mxu0 %v81_v12 }
  0x18   :  { %312 = vmatpush3.bf16.msra.mxu1 %v335_v15 }
  0x19   :  { %298 = vmatmul.mubr.msk.bf16.vlgmr.msra.gmra.mrb[0].mxu0 %vm75_vm2, %v23_v14  ;;  %313 = vmatprep.subr.bf16.mxu1 %v362_v1 }
  0x1c   :  { %314 = vmatpush3.bf16.msra.mxu1 %v336_v16 }
  0x1d   :  { %315 = vmatprep.subr.bf16.mxu1 %v362_v1 }
  0x20   :  { %316 = vmatpush3.bf16.msra.mxu1 %v337_v17 }
  0xec   :  { %v117_v19 = vpop.f32.mrb[0].mxu0 }
  0xed   :  { %v118_v20 = vadd.f32 %v252_v18, %v117_v19  ;;  %v299_v21 = vpop.f32.mrb[1].mxu0 }
  0xee   :  { %v120_v22 = vpop.f32.mrb[2].mxu0 }
  0xef   :  { %v123_v23 = vmax.f32 %v118_v20, 0.0  ;;  %v300_v24 = vpop.f32.mrb[3].mxu0 }
  0xf1   :  { %v124_v25 = vpack.c.bf16 %v123_v23, %v123_v23 }
  0xf3   :  { %318 = vmatmul.mubr.bf16.vlgmr.msra.gmra.mrb[0].mxu1 %v124_v25 }
 0x1c6   :  { %v230_v27 = vpop.f32.mrb[0].mxu1 }
 0x1c7   :  { %v231_v28 = vadd.f32 %v260_v26, %v230_v27  ;;  %v319_v29 = vpop.f32.mrb[1].mxu1 }
 0x1c8   :  { %v233_v30 = vpop.f32.mrb[2].mxu1 }
 0x1c9   :  { %v320_v31 = vpop.f32.mrb[3].mxu1  ;;  %237 = vst.msk [vmem:[#allocation2] sm:$0xff] %vm236_vm3, %v231_v28 }
 0x1ca   :  { %349 = shalt.err (!%p346_p4)
}
 0x1cb   :  { %s350_s4 = scalar_lea.hbm %s463_s5, 128 }
 0x1cc   :  { %p351_p5 = scmp.ne.s32.totalorder %s463_s5, %s350_s4  ;;  %p354_p6 = scmp.lt.u32.totalorder %s350_s4, %s463_s5 }
 0x1ce   :  { %p356_p7 = pnand %p354_p6, %p351_p5 }
 0x1d0   :  { %359 = shalt.err (!%p356_p7)
}
 0x1d1   :  { %247 = dma.vmem_to_hbm [thread:$0]  %s245_s26, 128, %s463_s5, [#allocation3]  }
 0x1d2   :  { %360 = dma.done.wait [#allocation3], 128  }
 0x1d3   :  { %361 = vsyncadd [#allocation3], 4294967168 }
 0x1d4   :  { %251 = vsyncpa [#allocation3], 1 }

</bundles_post_ra>
